<compile_context>
chip_gen: v5e
topology: v5e:2x2
jax: 0.10.0
libtpu: 0.0.40
codegen_flags: <defaults>
</compile_context>

<pallas_src>
import functools

import numpy as np
import jax
import jax.numpy as jnp
from jax.experimental import pallas as pl
from jax.experimental.pallas import tpu as pltpu


def _cbam_kernel(x_ref, w1t_ref, w2t_ref, mmaxT_ref, mmeanT_ref, sb_ref, o_ref, *,
                 Bt, inv_hw, inv_c):
    x = x_ref[...].astype(jnp.float32)                   # (Bt, C, HW), HW on lanes
    w1t = w1t_ref[...]                                   # (C, Cr)
    w2t = w2t_ref[...]                                   # (Cr, C)
    sbias = sb_ref[0]                                    # scalar bias (SMEM)

    # ---------------- Channel attention (batched over the tile) ----------------
    mx = jnp.max(x, axis=2)                              # (Bt, C)   lane reduce
    av = jnp.sum(x, axis=2) * inv_hw                     # (Bt, C)
    stats = jnp.concatenate([mx, av], axis=0)            # (2*Bt, C) -> one MLP pass
    h = jnp.maximum(
        jnp.dot(stats, w1t, preferred_element_type=jnp.float32), 0.0)   # (2*Bt, Cr)
    se = jnp.dot(h, w2t, preferred_element_type=jnp.float32)            # (2*Bt, C)
    ca = jax.nn.sigmoid(se[:Bt] + se[Bt:])               # (Bt, C)

    # ---------------- Channel gating ----------------
    out1 = x * ca[:, :, None]                            # (Bt, C, HW)

    # ---------------- Spatial attention ----------------
    smax = jnp.max(out1, axis=1)                         # (Bt, HW)  sublane reduce
    smean = jnp.sum(out1, axis=1) * inv_c                # (Bt, HW)
    conv = (jnp.dot(smax, mmaxT_ref[...], preferred_element_type=jnp.float32) +
            jnp.dot(smean, mmeanT_ref[...], preferred_element_type=jnp.float32))
    sa = jax.nn.sigmoid(conv + sbias)                    # (Bt, HW)

    # ------------- fused gate + residual:  out1*sa + x  (== x*ca*sa + x) -------------
    o_ref[...] = (out1 * sa[:, None, :] + x).astype(o_ref.dtype)


def _build_conv_operators(sw, H, W, K):
    """Dense transposed operators MmaxT, MmeanT (HW, HW) for the KxK SAME conv over the
    channel-max / channel-mean maps, so that (with row-vector stats of length HW):
        conv_row = smax_row @ MmaxT + smean_row @ MmeanT
    """
    P = K // 2
    HW = H * W
    sw = np.asarray(sw, dtype=np.float32).reshape(2, K, K)
    ops = np.zeros((2, HW, HW), dtype=np.float32)        # [channel, in_pos, out_pos]
    for c in range(2):
        for ky in range(K):
            dy = ky - P
            for kx in range(K):
                dx = kx - P
                wgt = sw[c, ky, kx]
                for y in range(H):
                    yy = y + dy
                    if not (0 <= yy < H):
                        continue
                    for x in range(W):
                        xx = x + dx
                        if not (0 <= xx < W):
                            continue
                        ops[c, yy * W + xx, y * W + x] += wgt
    return jnp.asarray(ops[0]), jnp.asarray(ops[1])


def cbam_block(x_nchw, w1, w2, sw, sb, *, batch_tile=1):
    """CBAM forward.

    x_nchw: (B, C, H, W) float32 (PyTorch layout; flattening to (B, C, H*W) is free).
    w1: (C//r, C)  first 1x1 conv weight (out, in), no bias
    w2: (C, C//r)  second 1x1 conv weight (out, in), no bias
    sw: (1, 2, K, K) spatial conv weight, sb: (1,) spatial conv bias.

    batch_tile: images per grid step.  On v7x keep B // batch_tile a multiple of 2 so
    the "parallel" grid axis shards across both TensorCores; on v5e/v6e raise it to
    amortize the ~600-cycle per-grid-step overhead (per-image VMEM is only ~128 KiB).
    """
    B, C, H, W = x_nchw.shape
    Cr = w1.shape[0]
    K = sw.shape[-1]
    HW = H * W
    assert B % batch_tile == 0, "batch_tile must divide B"
    assert HW % 128 == 0 and C % 8 == 0, "expect lane-dense HW and sublane-aligned C"

    x_flat = x_nchw.reshape(B, C, HW)                    # lane-dense: HW on lanes
    w1t = jnp.transpose(w1).astype(jnp.float32)          # (C, Cr)
    w2t = jnp.transpose(w2).astype(jnp.float32)          # (Cr, C)
    mmaxT, mmeanT = _build_conv_operators(sw, H, W, K)   # 2 x (HW, HW)
    sb = sb.astype(jnp.float32)                          # (1,)

    kernel = functools.partial(_cbam_kernel, Bt=batch_tile,
                               inv_hw=1.0 / float(HW), inv_c=1.0 / float(C))

    # advisory cost estimate: SE matmuls + spatial-conv matmuls + elementwise gating
    flops = B * (8 * C * Cr + 4 * HW * HW + 5 * C * HW)
    cost = pl.CostEstimate(flops=flops,
                           transcendentals=B * (C + HW),
                           bytes_accessed=2 * B * C * HW * 4 + 2 * HW * HW * 4)

    out_flat = pl.pallas_call(
        kernel,
        out_shape=jax.ShapeDtypeStruct((B, C, HW), x_nchw.dtype),
        grid=(B // batch_tile,),
        in_specs=[
            pl.BlockSpec((batch_tile, C, HW), lambda b: (b, 0, 0)),   # x
            pl.BlockSpec((C, Cr), lambda b: (0, 0)),                  # w1^T
            pl.BlockSpec((Cr, C), lambda b: (0, 0)),                  # w2^T
            pl.BlockSpec((HW, HW), lambda b: (0, 0)),                 # conv op (max half)
            pl.BlockSpec((HW, HW), lambda b: (0, 0)),                 # conv op (mean half)
            pl.BlockSpec(memory_space=pltpu.MemorySpace.SMEM),        # bias scalar
        ],
        out_specs=pl.BlockSpec((batch_tile, C, HW), lambda b: (b, 0, 0)),
        compiler_params=pltpu.CompilerParams(
            dimension_semantics=("parallel",)),
        cost_estimate=cost,
    )(x_flat, w1t, w2t, mmaxT, mmeanT, sb)

    return out_flat.reshape(B, C, H, W)


def cbam_reference(x_nchw, w1, w2, sw, sb):
    """Pure-JAX reference matching the PyTorch forward (NCHW layout)."""
    mx = jnp.max(x_nchw, axis=(2, 3))       # (B, C)
    av = jnp.mean(x_nchw, axis=(2, 3))      # (B, C)

    def se(v):
        return jax.nn.relu(v @ w1.T) @ w2.T

    ca = jax.nn.sigmoid(se(mx) + se(av))                         # (B, C)
    out = x_nchw * ca[:, :, None, None]
    smax = jnp.max(out, axis=1, keepdims=True)                   # (B, 1, H, W)
    smean = jnp.mean(out, axis=1, keepdims=True)                 # (B, 1, H, W)
    s_in = jnp.concatenate([smax, smean], axis=1)                # (B, 2, H, W)
    conv = jax.lax.conv_general_dilated(
        s_in, sw, window_strides=(1, 1), padding="SAME",
        dimension_numbers=("NCHW", "OIHW", "NCHW"))              # (B, 1, H, W)
    sa = jax.nn.sigmoid(conv + sb[0])
    return out * sa + x_nchw


if __name__ == "__main__":
    # Small shapes consistent with the module: channel=64, reduction=16, kernel_size=7
    B, C, H, W = 2, 64, 16, 16
    reduction = 16
    K = 7
    Cr = C // reduction

    key = jax.random.PRNGKey(0)
    k1, k2, k3, k4, k5 = jax.random.split(key, 5)
    x_nchw = jax.random.normal(k1, (B, C, H, W), dtype=jnp.float32)       # PyTorch NCHW
    w1 = jax.random.normal(k2, (Cr, C), dtype=jnp.float32) * 0.1          # Conv2d(C, C//r, 1)
    w2 = jax.random.normal(k3, (C, Cr), dtype=jnp.float32) * 0.1          # Conv2d(C//r, C, 1)
    sw = jax.random.normal(k4, (1, 2, K, K), dtype=jnp.float32) * 0.1     # Conv2d(2, 1, K)
    sb = jax.random.normal(k5, (1,), dtype=jnp.float32) * 0.1             # its bias

    ref = cbam_reference(x_nchw, w1, w2, sw, sb)

    # batch_tile=1 -> grid=(2,): parallel axis shards across both TensorCores on v7x.
    out1 = jax.block_until_ready(cbam_block(x_nchw, w1, w2, sw, sb, batch_tile=1))
    np.testing.assert_allclose(np.asarray(out1), np.asarray(ref), rtol=1e-4, atol=1e-4)

    # batch_tile=2 -> grid=(1,): exercises the vectorized multi-image path
    # (the larger-batch_tile configuration recommended for single-TC v5e/v6e).
    out2 = jax.block_until_ready(cbam_block(x_nchw, w1, w2, sw, sb, batch_tile=2))
    np.testing.assert_allclose(np.asarray(out2), np.asarray(ref), rtol=1e-4, atol=1e-4)

    print("KERNEL_OK")
</pallas_src>

<mosaic_0001>
module attributes {stable_mosaic.version = 11 : i64} {
  func.func @_cbam_kernel(%arg0: i32, %arg1: memref<1x64x256xf32, #tpu.memory_space<vmem>>, %arg2: memref<64x4xf32, #tpu.memory_space<vmem>>, %arg3: memref<4x64xf32, #tpu.memory_space<vmem>>, %arg4: memref<256x256xf32, #tpu.memory_space<vmem>>, %arg5: memref<256x256xf32, #tpu.memory_space<vmem>>, %arg6: memref<1xf32, #tpu.memory_space<smem>>, %arg7: memref<1x64x256xf32, #tpu.memory_space<vmem>>) attributes {dimension_semantics = [#tpu.dimension_semantics<parallel>], iteration_bounds = array<i64: 2>, scalar_prefetch = 0 : i64, scratch_operands = 0 : i64, tpu.core_type = #tpu.core_type<tc>, window_params = [{transform_indices = @transform_0, window_bounds = array<i64: 1, 64, 256>}, {pipeline_mode = #tpu.pipeline_mode<synchronous>, transform_indices = @transform_1, window_bounds = array<i64: 64, 4>}, {pipeline_mode = #tpu.pipeline_mode<synchronous>, transform_indices = @transform_2, window_bounds = array<i64: 4, 64>}, {pipeline_mode = #tpu.pipeline_mode<synchronous>, transform_indices = @transform_3, window_bounds = array<i64: 256, 256>}, {pipeline_mode = #tpu.pipeline_mode<synchronous>, transform_indices = @transform_4, window_bounds = array<i64: 256, 256>}, {transform_indices = @transform_5, window_bounds = array<i64: 1>}, {transform_indices = @transform_6, window_bounds = array<i64: 1, 64, 256>}]} {
    %c0 = arith.constant 0 : index
    %c0_0 = arith.constant 0 : index
    %c0_1 = arith.constant 0 : index
    %0 = vector.load %arg1[%c0, %c0_0, %c0_1] : memref<1x64x256xf32, #tpu.memory_space<vmem>>, vector<1x64x256xf32>
    %c0_2 = arith.constant 0 : index
    %c0_3 = arith.constant 0 : index
    %1 = vector.load %arg2[%c0_2, %c0_3] : memref<64x4xf32, #tpu.memory_space<vmem>>, vector<64x4xf32>
    %c0_4 = arith.constant 0 : index
    %c0_5 = arith.constant 0 : index
    %2 = vector.load %arg3[%c0_4, %c0_5] : memref<4x64xf32, #tpu.memory_space<vmem>>, vector<4x64xf32>
    %c0_6 = arith.constant 0 : index
    %3 = memref.load %arg6[%c0_6] : memref<1xf32, #tpu.memory_space<smem>>
    %cst = arith.constant dense<0xFF800000> : vector<1x64xf32>
    %4 = vector.multi_reduction <maximumf>, %0, %cst [2] : vector<1x64x256xf32> to vector<1x64xf32>
    %cst_7 = arith.constant dense<0.000000e+00> : vector<1x64xf32>
    %5 = vector.multi_reduction <add>, %0, %cst_7 [2] : vector<1x64x256xf32> to vector<1x64xf32>
    %cst_8 = arith.constant 3.906250e-03 : f32
    %6 = vector.broadcast %cst_8 : f32 to vector<1x64xf32>
    %7 = arith.mulf %5, %6 : vector<1x64xf32>
    %8 = tpu.concatenate %4, %7 in 0 : vector<1x64xf32>, vector<1x64xf32> -> vector<2x64xf32>
    %cst_9 = arith.constant dense<0.000000e+00> : vector<2x4xf32>
    %9 = tpu.matmul %8, %1, %cst_9 {dimension_numbers = #tpu.dot_dimension_numbers<[1], [0], [0], [1], [0, 0, 1, 1], [], []>} : vector<2x64xf32>, vector<64x4xf32>, vector<2x4xf32> -> vector<2x4xf32>
    %cst_10 = arith.constant 0.000000e+00 : f32
    %10 = vector.broadcast %cst_10 : f32 to vector<2x4xf32>
    %11 = arith.maximumf %9, %10 : vector<2x4xf32>
    %cst_11 = arith.constant dense<0.000000e+00> : vector<2x64xf32>
    %12 = tpu.matmul %11, %2, %cst_11 {dimension_numbers = #tpu.dot_dimension_numbers<[1], [0], [0], [1], [0, 0, 1, 1], [], []>} : vector<2x4xf32>, vector<4x64xf32>, vector<2x64xf32> -> vector<2x64xf32>
    %13 = vector.extract_strided_slice %12 {offsets = [0, 0], sizes = [1, 64], strides = [1, 1]} : vector<2x64xf32> to vector<1x64xf32>
    %14 = vector.extract_strided_slice %12 {offsets = [1, 0], sizes = [1, 64], strides = [1, 1]} : vector<2x64xf32> to vector<1x64xf32>
    %15 = arith.addf %13, %14 : vector<1x64xf32>
    %16 = arith.negf %15 : vector<1x64xf32>
    %17 = math.exp %16 : vector<1x64xf32>
    %cst_12 = arith.constant 1.000000e+00 : f32
    %18 = vector.broadcast %cst_12 : f32 to vector<1x64xf32>
    %19 = arith.addf %18, %17 : vector<1x64xf32>
    %20 = arith.divf %18, %19 : vector<1x64xf32>
    %21 = vector.shape_cast %20 : vector<1x64xf32> to vector<1x64x1xf32>
    %22 = vector.broadcast %21 : vector<1x64x1xf32> to vector<1x64x256xf32>
    %23 = arith.mulf %0, %22 : vector<1x64x256xf32>
    %cst_13 = arith.constant dense<0xFF800000> : vector<1x256xf32>
    %24 = vector.multi_reduction <maximumf>, %23, %cst_13 [1] : vector<1x64x256xf32> to vector<1x256xf32>
    %cst_14 = arith.constant dense<0.000000e+00> : vector<1x256xf32>
    %25 = vector.multi_reduction <add>, %23, %cst_14 [1] : vector<1x64x256xf32> to vector<1x256xf32>
    %cst_15 = arith.constant 1.562500e-02 : f32
    %26 = vector.broadcast %cst_15 : f32 to vector<1x256xf32>
    %27 = arith.mulf %25, %26 : vector<1x256xf32>
    %c0_16 = arith.constant 0 : index
    %c0_17 = arith.constant 0 : index
    %28 = vector.load %arg4[%c0_16, %c0_17] : memref<256x256xf32, #tpu.memory_space<vmem>>, vector<256x256xf32>
    %cst_18 = arith.constant dense<0.000000e+00> : vector<1x256xf32>
    %29 = tpu.matmul %24, %28, %cst_18 {dimension_numbers = #tpu.dot_dimension_numbers<[1], [0], [0], [1], [0, 0, 1, 1], [], []>} : vector<1x256xf32>, vector<256x256xf32>, vector<1x256xf32> -> vector<1x256xf32>
    %c0_19 = arith.constant 0 : index
    %c0_20 = arith.constant 0 : index
    %30 = vector.load %arg5[%c0_19, %c0_20] : memref<256x256xf32, #tpu.memory_space<vmem>>, vector<256x256xf32>
    %cst_21 = arith.constant dense<0.000000e+00> : vector<1x256xf32>
    %31 = tpu.matmul %27, %30, %cst_21 {dimension_numbers = #tpu.dot_dimension_numbers<[1], [0], [0], [1], [0, 0, 1, 1], [], []>} : vector<1x256xf32>, vector<256x256xf32>, vector<1x256xf32> -> vector<1x256xf32>
    %32 = arith.addf %29, %31 : vector<1x256xf32>
    %33 = vector.broadcast %3 : f32 to vector<1x256xf32>
    %34 = arith.addf %32, %33 : vector<1x256xf32>
    %35 = arith.negf %34 : vector<1x256xf32>
    %36 = math.exp %35 : vector<1x256xf32>
    %cst_22 = arith.constant 1.000000e+00 : f32
    %37 = vector.broadcast %cst_22 : f32 to vector<1x256xf32>
    %38 = arith.addf %37, %36 : vector<1x256xf32>
    %39 = arith.divf %37, %38 : vector<1x256xf32>
    %40 = vector.shape_cast %39 : vector<1x256xf32> to vector<1x1x256xf32>
    %41 = vector.broadcast %40 : vector<1x1x256xf32> to vector<1x64x256xf32>
    %42 = arith.mulf %23, %41 : vector<1x64x256xf32>
    %43 = arith.addf %42, %0 : vector<1x64x256xf32>
    %c0_23 = arith.constant 0 : index
    %c0_24 = arith.constant 0 : index
    %c0_25 = arith.constant 0 : index
    %44 = vector.load %arg7[%c0_23, %c0_24, %c0_25] : memref<1x64x256xf32, #tpu.memory_space<vmem>>, vector<1x64x256xf32>
    tpu.vector_store %arg7[%c0_23, %c0_24, %c0_25], %43 {strides = array<i32>} : memref<1x64x256xf32, #tpu.memory_space<vmem>>, vector<1x64x256xf32>,
    return
  }
  func.func @transform_0(%arg0: i32) -> (i32, i32, i32) {
    %c0_i32 = arith.constant 0 : i32
    %c0_i32_0 = arith.constant 0 : i32
    %c0_i32_1 = arith.constant 0 : i32
    return %arg0, %c0_i32, %c0_i32_0 : i32, i32, i32
  }
  func.func @transform_1(%arg0: i32) -> (i32, i32) {
    %c0_i32 = arith.constant 0 : i32
    %c0_i32_0 = arith.constant 0 : i32
    %c0_i32_1 = arith.constant 0 : i32
    return %c0_i32, %c0_i32_0 : i32, i32
  }
  func.func @transform_2(%arg0: i32) -> (i32, i32) {
    %c0_i32 = arith.constant 0 : i32
    %c0_i32_0 = arith.constant 0 : i32
    %c0_i32_1 = arith.constant 0 : i32
    return %c0_i32, %c0_i32_0 : i32, i32
  }
  func.func @transform_3(%arg0: i32) -> (i32, i32) {
    %c0_i32 = arith.constant 0 : i32
    %c0_i32_0 = arith.constant 0 : i32
    %c0_i32_1 = arith.constant 0 : i32
    return %c0_i32, %c0_i32_0 : i32, i32
  }
  func.func @transform_4(%arg0: i32) -> (i32, i32) {
    %c0_i32 = arith.constant 0 : i32
    %c0_i32_0 = arith.constant 0 : i32
    %c0_i32_1 = arith.constant 0 : i32
    return %c0_i32, %c0_i32_0 : i32, i32
  }
  func.func @transform_5(%arg0: i32) -> i32 {
    %c0_i32 = arith.constant 0 : i32
    %c0_i32_0 = arith.constant 0 : i32
    return %c0_i32 : i32
  }
  func.func @transform_6(%arg0: i32) -> (i32, i32, i32) {
    %c0_i32 = arith.constant 0 : i32
    %c0_i32_0 = arith.constant 0 : i32
    %c0_i32_1 = arith.constant 0 : i32
    return %arg0, %c0_i32, %c0_i32_0 : i32, i32, i32
  }
}

</mosaic_0001>

<bundles_post_ra>
// kernel: tpu_custom_call.1
= control target key start
LH: loop header
LB: loop body
LE: loop exit
PB: predicated region body
PF: predicated region fallthrough
CT: control target
= control target key end

     0   :  { %s1885_s0 = inlined_call_operand.hbm [shape: f32[2,64,256], index: 0, kind: input, shape index: {}]   ;;  %s1886_s1 = inlined_call_operand.vmem [shape: f32[64,4], index: 1, kind: input, shape index: {}]   ;;  %s1887_s2 = inlined_call_operand.vmem [shape: f32[4,64], index: 2, kind: input, shape index: {}]   ;;  %s1888_s3 = inlined_call_operand.hbm [shape: f32[256,256], index: 3, kind: input, shape index: {}]   ;;  %s1889_s4 = inlined_call_operand.hbm [shape: f32[256,256], index: 4, kind: input, shape index: {}]   ;;  %s1890_s5 = inlined_call_operand.<no memory space> [shape: f32[1], index: 5, kind: input, shape index: {}]   ;;  %s1891_s6 = inlined_call_operand.hbm [shape: f32[2,64,256], index: 6, kind: output, shape index: {}]  }
   0x1   :  { %11 = sst [smem:[#allocation2]] %s1890_s5 }
   0x2   :  { %12 = vsyncpa [#allocation4], 0 }
   0x3   :  { %14 = vsyncpa [#allocation4 + $0x1], 0 }
   0x4   :  { %15 = vsyncpa [#allocation7], 0 }
   0x5   :  { %16 = vsyncpa [#allocation5], 0 }
   0x6   :  { %18 = vsyncpa [#allocation5 + $0x1], 0  ;;  %s1476_s23 = smov 0   ;;  %s1478_s24 = smov 0  }
   0x7   :  { %s1480_s25 = smov 0   ;;  %s1482_s26 = smov 0  }
   0x8 LB: > { %s1497_s5 = sadd.s32 4294967295, %s1430_s26   ;;  %s1136_s27 = sadd.s32 4294967294, %s1430_s26   ;;  %s1430_s26 = sphi %s1482_s26, %s1903_s26   ;;  %s1426_s25 = sphi %s1480_s25, %s1902_s25   ;;  %s1422_s24 = sphi %s1478_s24, %s1901_s24   ;;  %s1418_s23 = sphi %s1476_s23, %s1900_s23  }
   0x9   : > { %p44_p0 = scmp.ne.s32.totalorder %s1422_s24, %s1418_s23  ;;  %p45_p1 = scmp.eq.s32.totalorder %s1497_s5, 0 }
   0xa   : > { %p173_p2 = scmp.eq.s32.totalorder %s1497_s5, 1  ;;  %p179_p3 = scmp.eq.s32.totalorder %s1136_s27, 1 }
   0xb   : > { %p1506_p4 = por %p45_p1, %p44_p0  ;;  %p1137_p5 = scmp.ge.s32.totalorder %s1430_s26, 1 }
   0xc   : > { %p1511_p6 = por %p179_p3, %p44_p0  ;;  %p186_p7 = scmp.lt.s32.totalorder %s1430_s26, 3 }
   0xd   : > { %s203_s8 = sshll.u32 %s1888_s3, 4  ;;  %s1432_s10 = smov [#allocation6]   ;;  %s204_s8 = int_to_ptr.hbm [resolvable:$true] %s203_s8 }
   0xe   : > { %p1519_p8 = pnand %p1137_p5, %p186_p7  ;;  %s205_s11 = sshll.u32 %s1432_s10, 4  ;;  %s206_s11 = int_to_ptr.vmem [resolvable:$true] %s205_s11 }
   0xf   : > { %s217_s14 = sshll.u32 %s1889_s4, 4  ;;  %s1892_s15 = smov 256   ;;  %s218_s14 = int_to_ptr.hbm [resolvable:$true] %s217_s14 }
  0x10   : > { %p1174_p9 = pneg %p1519_p8  ;;  %s1434_s16 = smov 16  }
  0x11   : > { %s1435_s17 = smov [#allocation8]   ;;  %s1538_s19 = sadd.s32 1, %s1430_s26  }
  0x12   : > { %p1175_p10 = pnand %p1174_p9, %p45_p1  ;;  %s219_s18 = sshll.u32 %s1435_s17, 4  ;;  %s220_s18 = int_to_ptr.vmem [resolvable:$true] %s219_s18 }
  0x13   : > { %s31_s20 = sadd.s32 1, %s1426_s25  ;;  %s28_s21 = ssub.s32 %s1430_s26, %s1538_s19 }
  0x14   : > { %1177 = dma.hbm_to_vmem [thread:$0]  (!%p1175_p10), %s204_s8, 8192, %s206_s11, [#allocation7], %s1892_s15, %s1892_s15, %s1434_s16  }
  0x15   : > { %1180 = dma.hbm_to_vmem [thread:$0]  (!%p1175_p10), %s218_s14, 8192, %s220_s18, [#allocation7], %s1892_s15, %s1892_s15, %s1434_s16  }
  0x16   : > { %p38_p12 = scmp.ne.s32.totalorder %s1426_s25, %s1422_s24  ;;  %p29_p13 = scmp.eq.s32.totalorder %s28_s21, 0 }
  0x17   : > { %p39_p0 = scmp.eq.s32.totalorder %s1430_s26, 0  ;;  %p1191_p5 = scmp.lt.s32.totalorder %s1430_s26, 2 }
  0x18   : > { %p1548_p3 = por %p173_p2, %p38_p12  ;;  %s236_s30 = sand.u32 1, %s1426_s25  }
  0x19   : > { %s1554_s27 = scalar_select %p29_p13, %s1426_s25, %s31_s20  }
  0x1a   : > { %p40_p7 = por %p39_p0, %p38_p12  ;;  %s1141_s7 = sshll.u32 %s236_s30, 7 }
  0x1b   : > { %s1160_s8 = sshll.u32 %s1430_s26, 7  ;;  %s240_s13 = scalar_lea.vmem [#allocation3], %s1141_s7 }
  0x1c   : > { %s245_s12 = scalar_lea.hbm %s1885_s0, %s1160_s8  ;;  %s248_s14 = sshll.u32 %s240_s13, 4  ;;  %s249_s14 = int_to_ptr.vmem [resolvable:$true] %s248_s14 }
  0x1d   : > { %s246_s17 = sshll.u32 %s245_s12, 4  ;;  %p1561_p2 = pnand %p1191_p5, %p40_p7  ;;  %s247_s17 = int_to_ptr.hbm [resolvable:$true] %s246_s17 }
  0x1e   : > { %s237_s20 = scalar_lea.sflag [#allocation4], %s236_s30  ;;  %s1330_s21 = sshra.s32 %s247_s17, 4  ;;  %s1331_s21 = int_to_ptr.hbm [resolvable:$true] %s1330_s21 }
  0x1f   : > { %s1332_s15 = scalar_lea.hbm %s1331_s21, 128  ;;  %p1334_p10 = pneg %p1561_p2 }
  0x20   : > { %p1333_p9 = scmp.ne.s32.totalorder %s1331_s21, %s1332_s15  ;;  %s1337_s10 = scalar_lea.hbm %s1885_s0, 256 }
  0x21   : > { %p1338_p0 = scmp.lt.s32.totalorder %s1331_s21, %s1885_s0  ;;  %p1339_p5 = scmp.lt.s32.totalorder %s1337_s10, %s1332_s15 }
  0x22   : > { %p1335_p12 = pnand %p1334_p10, %p1333_p9 }
  0x23   : > { %p1340_p7 = por %p1339_p5, %p1338_p0 }
  0x24   : > { %p1336_p13 = pneg %p1335_p12 }
  0x26   : > { %p1341_p11 = pnand %p1340_p7, %p1336_p13 }
  0x28   : > { %1344 = shalt.err (!%p1341_p11)
}
  0x29   : > { %s1898_s30 = smov 256   ;;  %260 = sbr.rel (%p1519_p8) target bundleno = 863 (0x35f), region = 44 }
  0x2a   : > { %1184 = dma.hbm_to_vmem [thread:$0]  (!%p1561_p2), %s247_s17, 2048, %s249_s14, %s237_s20, %s1898_s30, %s1898_s30, %s1434_s16  }
  0x2b   : > { %s1581_s13 = sand.u32 (!%p1519_p8), 1, %s1422_s24  }
  0x2c   : > { %s1145_s15 = sshll.u32 (!%p1519_p8), %s1581_s13, 7  ;;  %s263_s21 = scalar_lea.sflag (!%p1519_p8), [#allocation4], %s1581_s13 }
  0x2d   : > { %s1587_s8 = scalar_lea.vmem (!%p1519_p8), [#allocation3], %s1145_s15 }
  0x2e   : > { %1405 = dma.done.wait (%p1506_p4), %s263_s21, 2048  }
  0x2f   : > { %1407 = vsyncadd (%p1506_p4), %s263_s21, 4294965248 }
  0x30   : > { %1409 = dma.done.wait (%p45_p1), [#allocation7], 16384  }
  0x31   : > { %1411 = vsyncadd (%p45_p1), [#allocation7], 4294950912  ;;  %v1598_v0 = vld [vmem:[%s1587_s8 + $0x20] sm:$0xff]  ;;  %v1601_v1 = vld [vmem:[%s1587_s8 + $0x28] sm:$0xff]  ;;  %v396_v49 = vlaneseq  ;;  %vm401_vm0 = vcmask 130112   ;;  %vm405_vm1 = vcmask 195712  }
  0x32   : > { %v1604_v2 = vld [vmem:[%s1587_s8] sm:$0xff]  ;;  %v362_v3 = vadd.f32 %v1601_v1, %v1598_v0  ;;  %v1609_v4 = vld [vmem:[%s1587_s8 + $0x8] sm:$0xff]  ;;  %v1612_v5 = vld [vmem:[%s1587_s8 + $0x10] sm:$0xff]  ;;  %v338_v17 = vmax.f32 %v1598_v0, %v1601_v1  ;;  %vm409_vm2 = vcmask 261312   ;;  %vm413_vm3 = vcmask 326912   ;;  %s331_s18 = sld [smem:[#allocation2]] }
  0x33   : > { %v1615_v6 = vld [vmem:[%s1587_s8 + $0x18] sm:$0xff]  ;;  %v356_v7 = vadd.f32 %v1609_v4, %v1604_v2  ;;  %v1622_v9 = vld [vmem:[%s1587_s8 + $0x30] sm:$0xff]  ;;  %v332_v11 = vmax.f32 %v1604_v2, %v1609_v4  ;;  %v1634_v14 = vld [vmem:[%s1587_s8 + $0x40] sm:$0xff]  ;;  %v397_v50 = vand.u32 127, %v396_v49  ;;  %vm417_vm4 = vcmask 392512   ;;  %s1814_s20 = scalar_lea.vmem [#allocation9], %s1145_s15 }
  0x34   : > { %v335_v8 = vmax.f32 %v1612_v5, %v1615_v6  ;;  %363 = vadd.xlane.f32.xlu1 %v362_v3  ;;  %v1625_v10 = vld [vmem:[%s1587_s8 + $0x38] sm:$0xff]  ;;  %v359_v12 = vadd.f32 %v1615_v6, %v1612_v5  ;;  %v1637_v15 = vld [vmem:[%s1587_s8 + $0x48] sm:$0xff]  ;;  %v1646_v19 = vld [vmem:[%s1587_s8 + $0x50] sm:$0xff]  ;;  %vm421_vm5 = vcmask 458112   ;;  %vm425_vm6 = vcmask 523712   ;;  %s1161_s15 = sshll.u32 %s1497_s5, 7 }
  0x35   : > { %357 = vadd.xlane.f32.xlu0 %v356_v7  ;;  %v365_v13 = vadd.f32 %v1625_v10, %v1622_v9  ;;  %v368_v16 = vadd.f32 %v1637_v15, %v1634_v14  ;;  %v341_v18 = vmax.f32 %v1622_v9, %v1625_v10  ;;  %v1649_v20 = vld [vmem:[%s1587_s8 + $0x58] sm:$0xff]  ;;  %v1652_v21 = vld [vmem:[%s1587_s8 + $0x60] sm:$0xff]  ;;  %v1655_v22 = vld [vmem:[%s1587_s8 + $0x68] sm:$0xff]  ;;  %v344_v23 = vmax.f32 %v1634_v14, %v1637_v15  ;;  %s1040_s10 = scalar_lea.hbm %s1891_s6, %s1161_s15  ;;  %s1041_s11 = sshll.u32 %s1814_s20, 4  ;;  %s1042_s11 = int_to_ptr.vmem [resolvable:$true] %s1041_s11 }
  0x36   : > { %336 = vmax.xlane.f32.xlu2 %v335_v8  ;;  %v371_v24 = vadd.f32 %v1649_v20, %v1646_v19  ;;  %v374_v25 = vadd.f32 %v1655_v22, %v1652_v21  ;;  %v1664_v26 = vld [vmem:[%s1587_s8 + $0x70] sm:$0xff]  ;;  %v1667_v27 = vld [vmem:[%s1587_s8 + $0x78] sm:$0xff]  ;;  %v347_v29 = vmax.f32 %v1646_v19, %v1649_v20  ;;  %v350_v30 = vmax.f32 %v1652_v21, %v1655_v22  ;;  %v327_v37 = vld [vmem:[%s1886_s1 + $0x28] sm:$0xff]  ;;  %s1043_s12 = sshll.u32 %s1040_s10, 4  ;;  %s1029_s30 = scalar_lea.sflag [#allocation5], %s1581_s13  ;;  %s1044_s12 = int_to_ptr.hbm [resolvable:$true] %s1043_s12 }
  0x37   : > { %v377_v28 = vadd.f32 %v1667_v27, %v1664_v26  ;;  %v353_v31 = vmax.f32 %v1664_v26, %v1667_v27  ;;  %v329_v32 = vld [vmem:[%s1886_s1 + $0x38] sm:$0xff]  ;;  %v328_v33 = vld [vmem:[%s1886_s1 + $0x30] sm:$0xff]  ;;  %v326_v38 = vld [vmem:[%s1886_s1 + $0x20] sm:$0xff]  ;;  %v399_v54 = vadd.s32 4294967288, %v397_v50  ;;  %v403_v58 = vadd.s32 4294967280, %v397_v50  ;;  %s1374_s21 = sshra.s32 %s1044_s12, 4  ;;  %s1375_s21 = int_to_ptr.hbm [resolvable:$true] %s1374_s21 }
  0x38   : > { %466 = vmatpush.msra.mxu0 %v329_v32  ;;  %v325_v39 = vld [vmem:[%s1886_s1 + $0x18] sm:$0xff]  ;;  %v324_v40 = vld [vmem:[%s1886_s1 + $0x10] sm:$0xff]  ;;  %v323_v44 = vld [vmem:[%s1886_s1 + $0x8] sm:$0xff]  ;;  %v407_v61 = vadd.s32 4294967272, %v397_v50  ;;  %vm452_vm7 = vcmask 1040384   ;;  %vm454_vm8 = vcmask 523264   ;;  %p1381_p11 = scmp.lt.s32.totalorder %s1375_s21, %s1891_s6 }
  0x39   : > { %v322_v45 = vld [vmem:[%s1886_s1] sm:$0xff]  ;;  %vm483_vm9 = vcmask 1043456   ;;  %vm479_vm10 = vcmask 31744   ;;  %s1376_s28 = scalar_lea.hbm %s1375_s21, 128 }
  0x3a   : > { %467 = vmatpush.msra.mxu0 %v328_v33  ;;  %p1377_p1 = scmp.ne.s32.totalorder %s1375_s21, %s1376_s28 }
  0x3c   : > { %333 = vmax.xlane.f32.xlu1 %v332_v11  ;;  %468 = vmatpush.msra.mxu0 %v327_v37  ;;  %v411_v11 = vadd.s32 4294967264, %v397_v50  ;;  %v423_v37 = vadd.s32 4294967240, %v397_v50  ;;  %p1378_p4 = pnand %p1377_p1, %p1548_p3 }
  0x3d   : > { %360 = vadd.xlane.f32.xlu0 %v359_v12 }
  0x3e   : > { %366 = vadd.xlane.f32.xlu2 %v365_v13  ;;  %469 = vmatpush.msra.mxu0 %v326_v38  ;;  %p1379_p8 = pneg %p1378_p4 }
  0x40   : > { %470 = vmatpush.msra.mxu0 %v325_v39 }
  0x42   : > { %471 = vmatpush.msra.mxu0 %v324_v40 }
  0x44   : > { %369 = vadd.xlane.f32.xlu1 %v368_v16  ;;  %472 = vmatpush.msra.mxu0 %v323_v44  ;;  %v415_v16 = vadd.s32 4294967256, %v397_v50 }
  0x45   : > { %339 = vmax.xlane.f32.xlu0 %v338_v17 }
  0x46   : > { %342 = vmax.xlane.f32.xlu2 %v341_v18  ;;  %473 = vmatpush.msra.mxu0 %v322_v45  ;;  %v419_v18 = vadd.s32 4294967248, %v397_v50 }
  0x4c   : > { %345 = vmax.xlane.f32.xlu1 %v344_v23 }
  0x4d   : > { %372 = vadd.xlane.f32.xlu0 %v371_v24 }
  0x4e   : > { %375 = vadd.xlane.f32.xlu2 %v374_v25 }
  0x54   : > { %378 = vadd.xlane.f32.xlu1 %v377_v28 }
  0x55   : > { %348 = vmax.xlane.f32.xlu0 %v347_v29 }
  0x56   : > { %351 = vmax.xlane.f32.xlu2 %v350_v30 }
  0x5d   : > { %354 = vmax.xlane.f32.xlu0 %v353_v31 }
  0xa7   : > { %v364_v34 = vpop.xlane.xlu1 %363 }
  0xa8   : > { %v358_v35 = vpop.xlane.xlu0 %357  ;;  %v382_v59 = vmul.f32 0.00390625, %v364_v34 }
  0xa9   : > { %v337_v36 = vpop.xlane.xlu2 %336  ;;  %v380_v53 = vmul.f32 0.00390625, %v358_v35 }
  0xaa   : > { %v400_v62 = vperm.slane %v337_v36, %v399_v54  ;;  %v439_v13 = vperm.slane %v382_v59, %v403_v58 }
  0xab   : > { %v436_v60 = vperm.slane %v380_v53, %v397_v50 }
  0xaf   : > { %v334_v41 = vpop.xlane.xlu1 %333 }
  0xb0   : > { %v361_v42 = vpop.xlane.xlu0 %360  ;;  %v398_v63 = vperm.slane %v334_v41, %v397_v50 }
  0xb1   : > { %v367_v43 = vpop.xlane.xlu2 %366  ;;  %v381_v51 = vmul.f32 0.00390625, %v361_v42 }
  0xb2   : > { %v383_v3 = vmul.f32 0.00390625, %v367_v43  ;;  %v402_v25 = vsel %vm401_vm0, %v400_v62, %v398_v63 }
  0xb3   : > { %v437_v57 = vperm.slane %v381_v51, %v399_v54 }
  0xb4   : > { %v441_v29 = vperm.slane %v383_v3, %v407_v61 }
  0xb5   : > { %v438_v7 = vsel %vm401_vm0, %v437_v57, %v436_v60  ;;  %v330_v57 = vld [vmem:[%s1887_s2] sm:$0xf]  ;;  %v532_v60 = vshrl.u32 %v396_v49, 7 }
  0xb6   : > { %v440_v28 = vsel %vm405_vm1, %v439_v13, %v438_v7  ;;  %1150 = vmatpush.msk.msra.mxu1 %vm483_vm9, %v330_v57  ;;  %v733_v57 = vld [vmem:[#allocation8 + $0xa0] sm:$0xff] }
  0xb7   : > { %v370_v46 = vpop.xlane.xlu1 %369  ;;  %v442_v40 = vsel %vm409_vm2, %v441_v29, %v440_v28  ;;  %1233 = vset.pattern.permute.xlu1 %v532_v60  ;;  %v539_v62 = vadd.s32 8, %v532_v60 }
  0xb8   : > { %v340_v47 = vpop.xlane.xlu0 %339  ;;  %v384_v12 = vmul.f32 0.00390625, %v370_v46 }
  0xb9   : > { %v343_v48 = vpop.xlane.xlu2 %342  ;;  %v404_v8 = vperm.slane %v340_v47, %v403_v58  ;;  %1234 = vset.pattern.permute.xlu2 %v539_v62  ;;  %v763_v62 = vld [vmem:[#allocation8 + $0x190] sm:$0xff] }
  0xba   : > { %v408_v30 = vperm.slane %v343_v48, %v407_v61  ;;  %v443_v32 = vperm.slane %v384_v12, %v411_v11  ;;  %v545_v61 = vadd.s32 16, %v532_v60 }
  0xbb   : > { %v406_v31 = vsel %vm405_vm1, %v404_v8, %v402_v25 }
  0xbc   : > { %v410_v41 = vsel %vm409_vm2, %v408_v30, %v406_v31  ;;  %v444_v42 = vsel %vm413_vm3, %v443_v32, %v442_v40  ;;  %1235 = vset.pattern.permute.xlu0 %v545_v61  ;;  %v551_v31 = vadd.s32 24, %v532_v60  ;;  %v557_v32 = vadd.s32 32, %v532_v60  ;;  %v741_v40 = vld [vmem:[#allocation8 + $0xe0] sm:$0xff]  ;;  %v731_v61 = vld [vmem:[#allocation8 + $0x90] sm:$0xff] }
  0xbf   : > { %v346_v52 = vpop.xlane.xlu1 %345 }
  0xc0   : > { %v373_v55 = vpop.xlane.xlu0 %372  ;;  %v412_v33 = vperm.slane %v346_v52, %v411_v11 }
  0xc1   : > { %v376_v56 = vpop.xlane.xlu2 %375  ;;  %v385_v17 = vmul.f32 0.00390625, %v373_v55 }
  0xc2   : > { %v386_v34 = vmul.f32 0.00390625, %v376_v56  ;;  %v414_v43 = vsel %vm413_vm3, %v412_v33, %v410_v41  ;;  %v575_v33 = vadd.s32 56, %v532_v60  ;;  %v773_v41 = vld [vmem:[#allocation8 + $0x1e0] sm:$0xff] }
  0xc3   : > { %v445_v35 = vperm.slane %v385_v17, %v415_v16 }
  0xc4   : > { %v447_v44 = vperm.slane %v386_v34, %v419_v18  ;;  %v563_v34 = vadd.s32 40, %v532_v60 }
  0xc5   : > { %v446_v46 = vsel %vm417_vm4, %v445_v35, %v444_v42  ;;  %v569_v35 = vadd.s32 48, %v532_v60  ;;  %v742_v42 = vld [vmem:[#allocation8 + $0xe8] sm:$0xff] }
  0xc6   : > { %v448_v53 = vsel %vm421_vm5, %v447_v44, %v446_v46  ;;  %v739_v44 = vld [vmem:[#allocation8 + $0xd0] sm:$0xff]  ;;  %v740_v46 = vld [vmem:[#allocation8 + $0xd8] sm:$0xff]  ;;  %v766_v60 = vld [vmem:[#allocation8 + $0x1a8] sm:$0xff] }
  0xc7   : > { %v379_v24 = vpop.xlane.xlu1 %378 }
  0xc8   : > { %v349_v23 = vpop.xlane.xlu0 %348  ;;  %v387_v38 = vmul.f32 0.00390625, %v379_v24 }
  0xc9   : > { %v416_v36 = vperm.slane %v349_v23, %v415_v16  ;;  %v352_v39 = vpop.xlane.xlu2 %351 }
  0xca   : > { %v420_v45 = vperm.slane %v352_v39, %v419_v18  ;;  %v449_v48 = vperm.slane %v387_v38, %v423_v37  ;;  %v744_v38 = vld [vmem:[#allocation8 + $0xf8] sm:$0xff] }
  0xcb   : > { %v418_v47 = vsel %vm417_vm4, %v416_v36, %v414_v43  ;;  %v743_v36 = vld [vmem:[#allocation8 + $0xf0] sm:$0xff]  ;;  %v776_v39 = vld [vmem:[#allocation8 + $0x1f8] sm:$0xff]  ;;  %817 = vmatpush.msrb.mxu1 %v744_v38  ;;  %v774_v43 = vld [vmem:[#allocation8 + $0x1e8] sm:$0xff] }
  0xcc   : > { %v422_v52 = vsel %vm421_vm5, %v420_v45, %v418_v47  ;;  %v450_v55 = vsel %vm425_vm6, %v449_v48, %v448_v53  ;;  %777 = vmatpush.msra.mxu2 %v743_v36  ;;  %837 = vmatpush.msrb.mxu0 %v776_v39  ;;  %v771_v45 = vld [vmem:[#allocation8 + $0x1d0] sm:$0xff]  ;;  %v772_v47 = vld [vmem:[#allocation8 + $0x1d8] sm:$0xff]  ;;  %v737_v48 = vld [vmem:[#allocation8 + $0xc0] sm:$0xff] }
  0xcd   : > { %818 = vmatpush.msrb.mxu1 %v742_v42  ;;  %v735_v53 = vld [vmem:[#allocation8 + $0xb0] sm:$0xff]  ;;  %v720_v38 = vld [vmem:[#allocation8 + $0x38] sm:$0xff]  ;;  %v718_v42 = vld [vmem:[#allocation8 + $0x28] sm:$0xff] }
  0xce   : > { %778 = vmatpush.msra.mxu2 %v741_v40  ;;  %838 = vmatpush.msrb.mxu0 %v774_v43  ;;  %v719_v36 = vld [vmem:[#allocation8 + $0x30] sm:$0xff]  ;;  %v752_v39 = vld [vmem:[#allocation8 + $0x138] sm:$0xff]  ;;  %v717_v40 = vld [vmem:[#allocation8 + $0x20] sm:$0xff] }
  0xcf   : > { %819 = vmatpush.msrb.mxu1 %v740_v46  ;;  %v750_v43 = vld [vmem:[#allocation8 + $0x128] sm:$0xff]  ;;  %v716_v46 = vld [vmem:[#allocation8 + $0x18] sm:$0xff] }
  0xd0   : > { %v355_v51 = vpop.xlane.xlu0 %354  ;;  %779 = vmatpush.msra.mxu2 %v739_v44  ;;  %839 = vmatpush.msrb.mxu0 %v772_v47  ;;  %v715_v44 = vld [vmem:[#allocation8 + $0x10] sm:$0xff]  ;;  %v748_v47 = vld [vmem:[#allocation8 + $0x118] sm:$0xff] }
  0xd1   : > { %v424_v50 = vperm.slane %v355_v51, %v423_v37  ;;  %v775_v37 = vld [vmem:[#allocation8 + $0x1f0] sm:$0xff]  ;;  %v769_v51 = vld [vmem:[#allocation8 + $0x1c0] sm:$0xff] }
  0xd2   : > { %797 = vmatpush.msra.mxu3 %v775_v37  ;;  %780 = vmatpush.msra.mxu2 %v737_v48  ;;  %v751_v37 = vld [vmem:[#allocation8 + $0x130] sm:$0xff]  ;;  %v713_v48 = vld [vmem:[#allocation8] sm:$0xff] }
  0xd3   : > { %v426_v54 = vsel %vm425_vm6, %v424_v50, %v422_v52  ;;  %v738_v50 = vld [vmem:[#allocation8 + $0xc8] sm:$0xff] }
  0xd4   : > { %v453_v56 = vsel %vm452_vm7, %v426_v54, %v450_v55  ;;  %798 = vmatpush.msra.mxu3 %v773_v41  ;;  %v770_v52 = vld [vmem:[#allocation8 + $0x1c8] sm:$0xff]  ;;  %v767_v54 = vld [vmem:[#allocation8 + $0x1b0] sm:$0xff]  ;;  %820 = vmatpush.msrb.mxu1 %v738_v50  ;;  %v736_v55 = vld [vmem:[#allocation8 + $0xb8] sm:$0xff] }
  0xd5   : > { %1149 = vmatmul.msk.f32.vlgmr.msra.gmra.mxu0 %vm454_vm8, %v453_v56  ;;  %v768_v56 = vld [vmem:[#allocation8 + $0x1b8] sm:$0xff]  ;;  %781 = vmatpush.msra.mxu2 %v735_v53  ;;  %v749_v41 = vld [vmem:[#allocation8 + $0x120] sm:$0xff]  ;;  %v714_v50 = vld [vmem:[#allocation8 + $0x8] sm:$0xff] }
  0xd6   : > { %799 = vmatpush.msra.mxu3 %v771_v45  ;;  %840 = vmatpush.msrb.mxu0 %v770_v52  ;;  %v747_v45 = vld [vmem:[#allocation8 + $0x110] sm:$0xff]  ;;  %v746_v52 = vld [vmem:[#allocation8 + $0x108] sm:$0xff] }
  0xd7   : > { %821 = vmatpush.msrb.mxu1 %v736_v55  ;;  %782 = vmatpush.msra.mxu2 %v733_v57  ;;  %v679_v53 = vld [vmem:[#allocation6 + $0xf0] sm:$0xff]  ;;  %v680_v55 = vld [vmem:[#allocation6 + $0xf8] sm:$0xff]  ;;  %v677_v57 = vld [vmem:[#allocation6 + $0xe0] sm:$0xff] }
  0xd8   : > { %800 = vmatpush.msra.mxu3 %v769_v51  ;;  %841 = vmatpush.msrb.mxu0 %v768_v56  ;;  %v745_v51 = vld [vmem:[#allocation8 + $0x100] sm:$0xff]  ;;  %v712_v56 = vld [vmem:[#allocation6 + $0x1f8] sm:$0xff] }
  0xd9   : > { %783 = vmatpush.msra.mxu2 %v731_v61  ;;  %v675_v61 = vld [vmem:[#allocation6 + $0xd0] sm:$0xff] }
  0xda   : > { %801 = vmatpush.msra.mxu3 %v767_v54  ;;  %842 = vmatpush.msrb.mxu0 %v766_v60  ;;  %v711_v54 = vld [vmem:[#allocation6 + $0x1f0] sm:$0xff]  ;;  %v710_v60 = vld [vmem:[#allocation6 + $0x1e8] sm:$0xff] }
 0x152   : > { %v475_v58 = vpop.f32.mrf.mxu0 }
 0x153   : > { %v478_v59 = vmax.f32 %v475_v58, 0.0  ;;  %v765_v58 = vld [vmem:[#allocation8 + $0x1a0] sm:$0xff] }
 0x154   : > { %802 = vmatpush.msra.mxu3 %v765_v58  ;;  %v709_v58 = vld [vmem:[#allocation6 + $0x1e0] sm:$0xff] }
 0x155   : > { %1151 = vmatmul.msk.f32.vlgmr.msra.gmra.mxu1 %vm479_vm10, %v478_v59  ;;  %v734_v59 = vld [vmem:[#allocation8 + $0xa8] sm:$0xff] }
 0x156   : > { %822 = vmatpush.msrb.mxu1 %v734_v59  ;;  %803 = vmatpush.msra.mxu3 %v763_v62  ;;  %v678_v59 = vld [vmem:[#allocation6 + $0xe8] sm:$0xff]  ;;  %v707_v62 = vld [vmem:[#allocation6 + $0x1d0] sm:$0xff] }
 0x1d2   : > { %v504_v63 = vpop.f32.mrf.mxu1 }
 0x1d3   : > { %v508_v3 = vrot.slane %v504_v63, 1 }
 0x1d5   : > { %v510_v7 = vadd.f32 %v508_v3, %v504_v63  ;;  %v732_v63 = vld [vmem:[#allocation8 + $0x98] sm:$0xff] }
 0x1d6   : > { %v764_v3 = vld [vmem:[#allocation8 + $0x198] sm:$0xff]  ;;  %823 = vmatpush.msrb.mxu1 %v732_v63 }
 0x1d7   : > { %v1152_v8 = vmul.f32 -1.442695, %v510_v7  ;;  %v729_v7 = vld [vmem:[#allocation8 + $0x80] sm:$0xff]  ;;  %843 = vmatpush.msrb.mxu0 %v764_v3  ;;  %v676_v63 = vld [vmem:[#allocation6 + $0xd8] sm:$0xff] }
 0x1d8   : > { %784 = vmatpush.msra.mxu2 %v729_v7  ;;  %v708_v3 = vld [vmem:[#allocation6 + $0x1d8] sm:$0xff] }
 0x1d9   : > { %1242 = vpow2.f32 %v1152_v8  ;;  %v761_v8 = vld [vmem:[#allocation8 + $0x180] sm:$0xff] }
 0x1da   : > { %804 = vmatpush.msra.mxu3 %v761_v8  ;;  %v673_v8 = vld [vmem:[#allocation6 + $0xc0] sm:$0xff] }
 0x1df   : > { %v1243_v11 = vpop.eup %1242 }
 0x1e0   : > { %v514_v12 = vadd.f32 1.0, %v1243_v11  ;;  %v730_v11 = vld [vmem:[#allocation8 + $0x88] sm:$0xff] }
 0x1e1   : > { %824 = vmatpush.msrb.mxu1 %v730_v11  ;;  %v705_v11 = vld [vmem:[#allocation6 + $0x1c0] sm:$0xff] }
 0x1e2   : > { %1244 = vrcp.f32 %v514_v12  ;;  %v526_v18 = vand.u32 2147483648, %v514_v12  ;;  %v524_v49 = vand.u32 2147483647, %v514_v12  ;;  %vm520_vm12 = vweird.f32 %v514_v12 }
 0x1e4   : > { %v527_v25 = vor.u32 1.1754944e-38, %v526_v18  ;;  %vm525_vm14 = vcmp.eq.f32.partialorder %v524_v49, 8.507059e+37  ;;  %v760_v18 = vld [vmem:[#allocation8 + $0x178] sm:$0xff]  ;;  %v757_v49 = vld [vmem:[#allocation8 + $0x160] sm:$0xff] }
 0x1e8   : > { %v1245_v13 = vpop.eup %1244 }
 0x1e9   : > { %v516_v16 = vmul.f32 %v1245_v13, %v514_v12  ;;  %vm521_vm11 = vweird.f32 %v1245_v13  ;;  %v762_v12 = vld [vmem:[#allocation8 + $0x188] sm:$0xff] }
 0x1ea   : > { %vm522_vm13 = vmor %vm520_vm12, %vm521_vm11  ;;  %844 = vmatpush.msrb.mxu0 %v762_v12  ;;  %v674_v12 = vld [vmem:[#allocation6 + $0xc8] sm:$0xff] }
 0x1eb   : > { %v517_v17 = vsub.f32 1.0, %v516_v16  ;;  %v759_v16 = vld [vmem:[#allocation8 + $0x170] sm:$0xff] }
 0x1ec   : > { %805 = vmatpush.msra.mxu3 %v759_v16  ;;  %845 = vmatpush.msrb.mxu0 %v760_v18  ;;  %v671_v16 = vld [vmem:[#allocation6 + $0xb0] sm:$0xff]  ;;  %v672_v18 = vld [vmem:[#allocation6 + $0xb8] sm:$0xff] }
 0x1ed   : > { %v518_v23 = vmul.f32 %v1245_v13, %v517_v17  ;;  %v728_v17 = vld [vmem:[#allocation8 + $0x78] sm:$0xff] }
 0x1ee   : > { %825 = vmatpush.msrb.mxu1 %v728_v17  ;;  %806 = vmatpush.msra.mxu3 %v757_v49  ;;  %v703_v17 = vld [vmem:[#allocation6 + $0x1b0] sm:$0xff]  ;;  %v669_v49 = vld [vmem:[#allocation6 + $0xa0] sm:$0xff] }
 0x1ef   : > { %v519_v24 = vadd.f32 %v1245_v13, %v518_v23  ;;  %v725_v23 = vld [vmem:[#allocation8 + $0x60] sm:$0xff] }
 0x1f1   : > { %v523_v28 = vsel %vm522_vm13, %v1245_v13, %v519_v24  ;;  %v727_v13 = vld [vmem:[#allocation8 + $0x70] sm:$0xff]  ;;  %v726_v24 = vld [vmem:[#allocation8 + $0x68] sm:$0xff] }
 0x1f2   : > { %v528_v29 = vsel %vm525_vm14, %v527_v25, %v523_v28  ;;  %785 = vmatpush.msra.mxu2 %v727_v13  ;;  %v758_v25 = vld [vmem:[#allocation8 + $0x168] sm:$0xff]  ;;  %826 = vmatpush.msrb.mxu1 %v726_v24  ;;  %v723_v28 = vld [vmem:[#allocation8 + $0x50] sm:$0xff]  ;;  %v701_v24 = vld [vmem:[#allocation6 + $0x1a0] sm:$0xff] }
 0x1f3   : > { %v530_v30 = vperm.slane %v528_v29, 0  ;;  %846 = vmatpush.msrb.mxu0 %v758_v25  ;;  %v755_v29 = vld [vmem:[#allocation8 + $0x150] sm:$0xff]  ;;  %v706_v13 = vld [vmem:[#allocation6 + $0x1c8] sm:$0xff] }
 0x1f4   : > { %786 = vmatpush.msra.mxu2 %v725_v23  ;;  %807 = vmatpush.msra.mxu3 %v755_v29  ;;  %v704_v23 = vld [vmem:[#allocation6 + $0x1b8] sm:$0xff]  ;;  %v670_v25 = vld [vmem:[#allocation6 + $0xa8] sm:$0xff]  ;;  %v667_v29 = vld [vmem:[#allocation6 + $0x90] sm:$0xff] }
 0x1f5   : > { %547 = vperm.xlu0 %1235, %v530_v30   ;;  %541 = vperm.xlu2 %1234, %v530_v30  }
 0x1f6   : > { %535 = vperm.xlu1 %1233, %v530_v30   ;;  %787 = vmatpush.msra.mxu2 %v723_v28  ;;  %v702_v28 = vld [vmem:[#allocation6 + $0x1a8] sm:$0xff] }
 0x1fd   : > { %1236 = vset.pattern.permute.xlu2 %v551_v31  ;;  %1241 = vset.pattern.permute.xlu0 %v575_v33  ;;  %v756_v31 = vld [vmem:[#allocation8 + $0x158] sm:$0xff] }
 0x1fe   : > { %1237 = vset.pattern.permute.xlu1 %v557_v32  ;;  %v721_v32 = vld [vmem:[#allocation8 + $0x40] sm:$0xff]  ;;  %847 = vmatpush.msrb.mxu0 %v756_v31  ;;  %v668_v31 = vld [vmem:[#allocation6 + $0x98] sm:$0xff] }
 0x1ff   : > { %788 = vmatpush.msra.mxu2 %v721_v32  ;;  %v700_v32 = vld [vmem:[#allocation6 + $0x198] sm:$0xff] }
 0x201   : > { %789 = vmatpush.msra.mxu2 %v719_v36  ;;  %v666_v36 = vld [vmem:[#allocation6 + $0x88] sm:$0xff] }
 0x203   : > { %790 = vmatpush.msra.mxu2 %v717_v40  ;;  %v695_v40 = vld [vmem:[#allocation6 + $0x170] sm:$0xff] }
 0x205   : > { %553 = vperm.xlu2 %1236, %v530_v30   ;;  %791 = vmatpush.msra.mxu2 %v715_v44 }
 0x206   : > { %559 = vperm.xlu1 %1237, %v530_v30  }
 0x207   : > { %792 = vmatpush.msra.mxu2 %v713_v48  ;;  %v694_v48 = vld [vmem:[#allocation6 + $0x168] sm:$0xff] }
 0x209   : > { %857 = vmatpush.msrb.mxu2 %v679_v53 }
 0x20b   : > { %858 = vmatpush.msrb.mxu2 %v677_v57  ;;  %v657_v57 = vld [vmem:[#allocation6 + $0x40] sm:$0xff] }
 0x20d   : > { %1238 = vset.pattern.permute.xlu2 %v563_v34  ;;  %v722_v34 = vld [vmem:[#allocation8 + $0x48] sm:$0xff]  ;;  %859 = vmatpush.msrb.mxu2 %v675_v61 }
 0x20e   : > { %1239 = vset.pattern.permute.xlu1 %v569_v35  ;;  %v754_v35 = vld [vmem:[#allocation8 + $0x148] sm:$0xff] }
 0x20f   : > { %848 = vmatpush.msrb.mxu0 %v754_v35  ;;  %860 = vmatpush.msrb.mxu2 %v673_v8  ;;  %v697_v35 = vld [vmem:[#allocation6 + $0x180] sm:$0xff] }
 0x211   : > { %849 = vmatpush.msrb.mxu0 %v752_v39  ;;  %861 = vmatpush.msrb.mxu2 %v671_v16  ;;  %v663_v39 = vld [vmem:[#allocation6 + $0x70] sm:$0xff] }
 0x213   : > { %850 = vmatpush.msrb.mxu0 %v750_v43  ;;  %862 = vmatpush.msrb.mxu2 %v669_v49  ;;  %v661_v43 = vld [vmem:[#allocation6 + $0x60] sm:$0xff]  ;;  %v651_v49 = vld [vmem:[#allocation6 + $0x10] sm:$0xff] }
 0x215   : > { %565 = vperm.xlu2 %1238, %v530_v30   ;;  %851 = vmatpush.msrb.mxu0 %v748_v47  ;;  %v662_v47 = vld [vmem:[#allocation6 + $0x68] sm:$0xff] }
 0x216   : > { %571 = vperm.xlu1 %1239, %v530_v30   ;;  %863 = vmatpush.msrb.mxu2 %v667_v29 }
 0x217   : > { %852 = vmatpush.msrb.mxu0 %v746_v52  ;;  %v691_v52 = vld [vmem:[#allocation6 + $0x150] sm:$0xff] }
 0x219   : > { %917 = vmatpush.msra.mxu0 %v712_v56 }
 0x21b   : > { %918 = vmatpush.msra.mxu0 %v710_v60 }
 0x21d   : > { %1240 = vset.pattern.permute.xlu2 %v575_v33  ;;  %v753_v33 = vld [vmem:[#allocation8 + $0x140] sm:$0xff]  ;;  %919 = vmatpush.msra.mxu0 %v708_v3  ;;  %v687_v3 = vld [vmem:[#allocation6 + $0x130] sm:$0xff] }
 0x21e   : > { %808 = vmatpush.msra.mxu3 %v753_v33  ;;  %v665_v33 = vld [vmem:[#allocation6 + $0x80] sm:$0xff] }
 0x21f   : > { %920 = vmatpush.msra.mxu0 %v706_v13  ;;  %864 = vmatpush.msrb.mxu2 %v665_v33  ;;  %v685_v13 = vld [vmem:[#allocation6 + $0x120] sm:$0xff] }
 0x220   : > { %809 = vmatpush.msra.mxu3 %v751_v37 }
 0x221   : > { %921 = vmatpush.msra.mxu0 %v704_v23  ;;  %865 = vmatpush.msrb.mxu2 %v663_v39 }
 0x222   : > { %810 = vmatpush.msra.mxu3 %v749_v41  ;;  %v664_v41 = vld [vmem:[#allocation6 + $0x78] sm:$0xff] }
 0x223   : > { %922 = vmatpush.msra.mxu0 %v702_v28  ;;  %866 = vmatpush.msrb.mxu2 %v661_v43  ;;  %v684_v28 = vld [vmem:[#allocation6 + $0x118] sm:$0xff] }
 0x224   : > { %811 = vmatpush.msra.mxu3 %v747_v45 }
 0x225   : > { %577 = vperm.xlu2 %1240, %v530_v30   ;;  %v724_v30 = vld [vmem:[#allocation8 + $0x58] sm:$0xff]  ;;  %923 = vmatpush.msra.mxu0 %v700_v32 }
 0x226   : > { %827 = vmatpush.msrb.mxu1 %v724_v30  ;;  %812 = vmatpush.msra.mxu3 %v745_v51  ;;  %v699_v30 = vld [vmem:[#allocation6 + $0x190] sm:$0xff] }
 0x228   : > { %828 = vmatpush.msrb.mxu1 %v722_v34  ;;  %877 = vmatpush.msrb.mxu3 %v711_v54  ;;  %v692_v54 = vld [vmem:[#allocation6 + $0x158] sm:$0xff] }
 0x22a   : > { %829 = vmatpush.msrb.mxu1 %v720_v38  ;;  %878 = vmatpush.msrb.mxu3 %v709_v58  ;;  %v698_v38 = vld [vmem:[#allocation6 + $0x188] sm:$0xff] }
 0x22b   : > { %924 = vmatpush.msra.mxu0 %v698_v38  ;;  %v658_v58 = vld [vmem:[#allocation6 + $0x48] sm:$0xff] }
 0x22c   : > { %830 = vmatpush.msrb.mxu1 %v718_v42  ;;  %879 = vmatpush.msrb.mxu3 %v707_v62  ;;  %v696_v42 = vld [vmem:[#allocation6 + $0x178] sm:$0xff] }
 0x22d   : > { %925 = vmatpush.msra.mxu0 %v696_v42 }
 0x22e   : > { %831 = vmatpush.msrb.mxu1 %v716_v46  ;;  %880 = vmatpush.msrb.mxu3 %v705_v11  ;;  %v693_v46 = vld [vmem:[#allocation6 + $0x160] sm:$0xff] }
 0x22f   : > { %926 = vmatpush.msra.mxu0 %v694_v48 }
 0x230   : > { %832 = vmatpush.msrb.mxu1 %v714_v50  ;;  %881 = vmatpush.msrb.mxu3 %v703_v17  ;;  %v654_v17 = vld [vmem:[#allocation6 + $0x28] sm:$0xff] }
 0x231   : > { %927 = vmatpush.msra.mxu0 %v692_v54 }
 0x232   : > { %897 = vmatpush.msra.mxu1 %v680_v55  ;;  %882 = vmatpush.msrb.mxu3 %v701_v24  ;;  %v683_v24 = vld [vmem:[#allocation6 + $0x110] sm:$0xff] }
 0x234   : > { %898 = vmatpush.msra.mxu1 %v678_v59  ;;  %883 = vmatpush.msrb.mxu3 %v699_v30  ;;  %v690_v59 = vld [vmem:[#allocation6 + $0x148] sm:$0xff] }
 0x235   : > { %928 = vmatpush.msra.mxu0 %v690_v59 }
 0x236   : > { %899 = vmatpush.msra.mxu1 %v676_v63  ;;  %884 = vmatpush.msrb.mxu3 %v697_v35  ;;  %v655_v63 = vld [vmem:[#allocation6 + $0x30] sm:$0xff]  ;;  %v650_v35 = vld [vmem:[#allocation6 + $0x8] sm:$0xff] }
 0x238   : > { %900 = vmatpush.msra.mxu1 %v674_v12  ;;  %885 = vmatpush.msrb.mxu3 %v695_v40  ;;  %v653_v12 = vld [vmem:[#allocation6 + $0x20] sm:$0xff] }
 0x23a   : > { %901 = vmatpush.msra.mxu1 %v672_v18  ;;  %886 = vmatpush.msrb.mxu3 %v693_v46  ;;  %v686_v18 = vld [vmem:[#allocation6 + $0x128] sm:$0xff] }
 0x23c   : > { %902 = vmatpush.msra.mxu1 %v670_v25  ;;  %887 = vmatpush.msrb.mxu3 %v691_v52  ;;  %v652_v25 = vld [vmem:[#allocation6 + $0x18] sm:$0xff] }
 0x23e   : > { %903 = vmatpush.msra.mxu1 %v668_v31  ;;  %v681_v31 = vld [vmem:[#allocation6 + $0x100] sm:$0xff] }
 0x240   : > { %904 = vmatpush.msra.mxu1 %v666_v36  ;;  %v682_v36 = vld [vmem:[#allocation6 + $0x108] sm:$0xff] }
 0x242   : > { %905 = vmatpush.msra.mxu1 %v664_v41 }
 0x244   : > { %906 = vmatpush.msra.mxu1 %v662_v47 }
 0x24f   : > { %v542_v7 = vpop.permute.xlu2 %541 }
 0x250   : > { %v1723_v51 = vmul.f32 %v542_v7, %v1612_v5  ;;  %v1726_v50 = vmul.f32 %v542_v7, %v1615_v6  ;;  %v689_v6 = vld [vmem:[#allocation6 + $0x140] sm:$0xff]  ;;  %v656_v7 = vld [vmem:[#allocation6 + $0x38] sm:$0xff] }
 0x251   : > { %888 = vmatpush.msrb.mxu3 %v689_v6 }
 0x253   : > { %889 = vmatpush.msrb.mxu3 %v687_v3 }
 0x255   : > { %890 = vmatpush.msrb.mxu3 %v685_v13 }
 0x257   : > { %891 = vmatpush.msrb.mxu3 %v683_v24 }
 0x259   : > { %892 = vmatpush.msrb.mxu3 %v681_v31 }
 0x25f   : > { %v1714_v34 = vpop.permute.xlu2 %553 }
 0x260   : > { %v1740_v8 = vmul.f32 %v1714_v34, %v1622_v9  ;;  %v1746_v16 = vmul.f32 %v1714_v34, %v1625_v10 }
 0x262   : > { %v596_v10 = vmax.f32 %v1723_v51, %v1740_v8  ;;  %v609_v32 = vmax.f32 %v1726_v50, %v1746_v16 }
 0x267   : > { %v548_v53 = vpop.permute.xlu0 %547 }
 0x268   : > { %v536_v37 = vpop.permute.xlu1 %535  ;;  %v1733_v60 = vmul.f32 %v548_v53, %v1598_v0  ;;  %v1736_v61 = vmul.f32 %v548_v53, %v1601_v1  ;;  %v688_v1 = vld [vmem:[#allocation6 + $0x138] sm:$0xff] }
 0x269   : > { %v1717_v44 = vmul.f32 %v536_v37, %v1604_v2  ;;  %v1720_v45 = vmul.f32 %v536_v37, %v1609_v4  ;;  %v659_v2 = vld [vmem:[#allocation6 + $0x50] sm:$0xff]  ;;  %v660_v4 = vld [vmem:[#allocation6 + $0x58] sm:$0xff]  ;;  %929 = vmatpush.msra.mxu0 %v688_v1 }
 0x26a   : > { %867 = vmatpush.msrb.mxu2 %v659_v2  ;;  %907 = vmatpush.msra.mxu1 %v660_v4 }
 0x26b   : > { %v621_v55 = vadd.f32 %v1723_v51, %v1717_v44  ;;  %v634_v56 = vadd.f32 %v1726_v50, %v1720_v45  ;;  %930 = vmatpush.msra.mxu0 %v686_v18  ;;  %v595_v37 = vmax.f32 %v1717_v44, %v1733_v60 }
 0x26c   : > { %868 = vmatpush.msrb.mxu2 %v657_v57  ;;  %908 = vmatpush.msra.mxu1 %v658_v58 }
 0x26d   : > { %v622_v11 = vadd.f32 %v621_v55, %v1733_v60  ;;  %v635_v0 = vadd.f32 %v634_v56, %v1736_v61  ;;  %931 = vmatpush.msra.mxu0 %v684_v28 }
 0x26e   : > { %869 = vmatpush.msrb.mxu2 %v655_v63  ;;  %909 = vmatpush.msra.mxu1 %v656_v7 }
 0x26f   : > { %v566_v5 = vpop.permute.xlu2 %565  ;;  %v623_v29 = vadd.f32 %v622_v11, %v1740_v8  ;;  %v636_v30 = vadd.f32 %v635_v0, %v1746_v16  ;;  %932 = vmatpush.msra.mxu0 %v682_v36 }
 0x270   : > { %870 = vmatpush.msrb.mxu2 %v653_v12  ;;  %910 = vmatpush.msra.mxu1 %v654_v17  ;;  %v1761_v33 = vmul.f32 %v566_v5, %v1646_v19  ;;  %v1764_v34 = vmul.f32 %v566_v5, %v1649_v20  ;;  %v608_v19 = vmax.f32 %v1720_v45, %v1736_v61 }
 0x272   : > { %871 = vmatpush.msrb.mxu2 %v651_v49  ;;  %911 = vmatpush.msra.mxu1 %v652_v25  ;;  %v598_v41 = vmax.f32 %v596_v10, %v1761_v33  ;;  %v611_v42 = vmax.f32 %v609_v32, %v1764_v34 }
 0x274   : > { %912 = vmatpush.msra.mxu1 %v650_v35 }
 0x278   : > { %v560_v62 = vpop.permute.xlu1 %559 }
 0x279   : > { %v1749_v9 = vmul.f32 %v560_v62, %v1634_v14  ;;  %v1752_v23 = vmul.f32 %v560_v62, %v1637_v15  ;;  %v649_v15 = vld [vmem:[#allocation6] sm:$0xff] }
 0x27a   : > { %872 = vmatpush.msrb.mxu2 %v649_v15 }
 0x27b   : > { %v624_v38 = vadd.f32 %v623_v29, %v1749_v9  ;;  %v637_v39 = vadd.f32 %v636_v30, %v1752_v23  ;;  %v597_v43 = vmax.f32 %v595_v37, %v1749_v9  ;;  %v610_v46 = vmax.f32 %v608_v19, %v1752_v23 }
 0x27d   : > { %v625_v48 = vadd.f32 %v624_v38, %v1761_v33 }
 0x27f   : > { %v578_v14 = vpop.permute.xlu2 %577 }
 0x280   : > { %v1773_v40 = vmul.f32 %v578_v14, %v1664_v26  ;;  %v1776_v20 = vmul.f32 %v578_v14, %v1667_v27  ;;  %v638_v26 = vadd.f32 %v637_v39, %v1764_v34 }
 0x282   : > { %v600_v52 = vmax.f32 %v598_v41, %v1773_v40  ;;  %v613_v53 = vmax.f32 %v611_v42, %v1776_v20 }
 0x288   : > { %v572_v47 = vpop.permute.xlu1 %571 }
 0x289   : > { %v1785_v27 = vmul.f32 %v572_v47, %v1652_v21  ;;  %v1788_v2 = vmul.f32 %v572_v47, %v1655_v22 }
 0x28b   : > { %v599_v4 = vmax.f32 %v597_v43, %v1785_v27  ;;  %v612_v54 = vmax.f32 %v610_v46, %v1788_v2  ;;  %v626_v55 = vadd.f32 %v625_v48, %v1785_v27  ;;  %v639_v56 = vadd.f32 %v638_v26, %v1788_v2 }
 0x28c   : > { %v937_v46 = vstv %s331_s18 }
 0x28d   : > { %v601_v5 = vmax.f32 %v599_v4, %v600_v52  ;;  %v614_v57 = vmax.f32 %v612_v54, %v613_v53  ;;  %v627_v21 = vadd.f32 %v626_v55, %v1773_v40  ;;  %v640_v6 = vadd.f32 %v639_v56, %v1776_v20 }
 0x28f   : > { %v602_v22 = vrot.slane %v601_v5, 4  ;;  %v615_v58 = vrot.slane %v614_v57, 4  ;;  %v628_v59 = vrot.slane %v627_v21, 4  ;;  %v641_v62 = vrot.slane %v640_v6, 4 }
 0x291   : > { %v629_v63 = vadd.f32 %v628_v59, %v627_v21  ;;  %v642_v3 = vadd.f32 %v641_v62, %v640_v6  ;;  %v603_v0 = vmax.f32 %v601_v5, %v602_v22  ;;  %v616_v1 = vmax.f32 %v614_v57, %v615_v58 }
 0x293   : > { %v630_v7 = vrot.slane %v629_v63, 2  ;;  %v643_v11 = vrot.slane %v642_v3, 2  ;;  %v604_v49 = vrot.slane %v603_v0, 2  ;;  %v617_v24 = vrot.slane %v616_v1, 2 }
 0x295   : > { %v631_v12 = vadd.f32 %v630_v7, %v629_v63  ;;  %v644_v13 = vadd.f32 %v643_v11, %v642_v3  ;;  %v605_v30 = vmax.f32 %v603_v0, %v604_v49  ;;  %v618_v14 = vmax.f32 %v616_v1, %v617_v24 }
 0x297   : > { %v632_v17 = vrot.slane %v631_v12, 1  ;;  %v645_v18 = vrot.slane %v644_v13, 1  ;;  %v606_v15 = vrot.slane %v605_v30, 1  ;;  %v619_v31 = vrot.slane %v618_v14, 1 }
 0x299   : > { %v633_v25 = vadd.f32 %v632_v17, %v631_v12  ;;  %v646_v28 = vadd.f32 %v645_v18, %v644_v13  ;;  %v607_v32 = vmax.f32 %v605_v30, %v606_v15  ;;  %v620_v35 = vmax.f32 %v618_v14, %v619_v31 }
 0x29b   : > { %v647_v10 = vmul.f32 0.015625, %v633_v25  ;;  %v648_v29 = vmul.f32 0.015625, %v646_v28 }
 0x29d   : > { %793 = vmatmul.f32.vlgmr.msra.gmra.mxu2 %v647_v10  ;;  %813 = vmatmul.f32.vlgmr.msra.gmra.mxu3 %v648_v29 }
 0x29e   : > { %833 = vmatmul.f32.vlgmr.msrb.gmra.mxu1 %v647_v10  ;;  %853 = vmatmul.f32.vlgmr.msrb.gmra.mxu0 %v648_v29 }
 0x2a5   : > { %873 = vmatmul.f32.vlgmr.msrb.gmra.mxu2 %v607_v32  ;;  %893 = vmatmul.f32.vlgmr.msrb.gmra.mxu3 %v620_v35 }
 0x2a6   : > { %913 = vmatmul.f32.vlgmr.msra.gmra.mxu1 %v607_v32  ;;  %933 = vmatmul.f32.vlgmr.msra.gmra.mxu0 %v620_v35 }
 0x31b   : > { %v834_v36 = vpop.f32.mrf.mxu1  ;;  %v854_v37 = vpop.f32.mrf.mxu0 }
 0x31c   : > { %v855_v19 = vadd.f32 %v854_v37, %v834_v36  ;;  %v1254_v36 = vld [vmem:[%s1587_s8 + $0x8] sm:$0xff] }
 0x320   : > { %v794_v38 = vpop.f32.mrf.mxu2  ;;  %v814_v39 = vpop.f32.mrf.mxu3 }
 0x321   : > { %v815_v48 = vadd.f32 %v814_v39, %v794_v38  ;;  %v1255_v38 = vld [vmem:[%s1587_s8 + $0x18] sm:$0xff]  ;;  %v1256_v39 = vld [vmem:[%s1587_s8 + $0x28] sm:$0xff] }
 0x323   : > { %v914_v41 = vpop.f32.mrf.mxu1  ;;  %v934_v43 = vpop.f32.mrf.mxu0 }
 0x324   : > { %v915_v42 = vadd.f32 %v914_v41, %v855_v19 }
 0x326   : > { %v935_v47 = vadd.f32 %v934_v43, %v915_v42 }
 0x328   : > { %v939_v26 = vadd.f32 %v937_v46, %v935_v47  ;;  %v874_v52 = vpop.f32.mrf.mxu2  ;;  %v894_v54 = vpop.f32.mrf.mxu3 }
 0x329   : > { %v875_v53 = vadd.f32 %v874_v52, %v815_v48 }
 0x32a   : > { %v1154_v4 = vmul.f32 -1.442695, %v939_v26  ;;  %v1261_v26 = vld [vmem:[%s1587_s8 + $0x78] sm:$0xff] }
 0x32b   : > { %v895_v55 = vadd.f32 %v894_v54, %v875_v53 }
 0x32c   : > { %1246 = vpow2.f32 %v1154_v4 }
 0x32d   : > { %v938_v56 = vadd.f32 %v937_v46, %v895_v55  ;;  %v1260_v46 = vld [vmem:[%s1587_s8 + $0x68] sm:$0xff] }
 0x32f   : > { %v1153_v5 = vmul.f32 -1.442695, %v938_v56 }
 0x331   : > { %1248 = vpow2.f32 %v1153_v5 }
 0x332   : > { %v1247_v57 = vpop.eup %1246 }
 0x333   : > { %v947_v21 = vadd.f32 1.0, %v1247_v57 }
 0x335   : > { %1250 = vrcp.f32 %v947_v21  ;;  %v974_v63 = vand.u32 2147483648, %v947_v21  ;;  %v972_v11 = vand.u32 2147483647, %v947_v21  ;;  %vm968_vm0 = vweird.f32 %v947_v21 }
 0x337   : > { %v1249_v6 = vpop.eup %1248  ;;  %v975_v12 = vor.u32 1.1754944e-38, %v974_v63  ;;  %vm973_vm2 = vcmp.eq.f32.partialorder %v972_v11, 8.507059e+37  ;;  %v1268_v63 = vld [vmem:[%s1587_s8 + $0x60] sm:$0xff] }
 0x338   : > { %v946_v22 = vadd.f32 1.0, %v1249_v6  ;;  %v1264_v6 = vld [vmem:[%s1587_s8 + $0x20] sm:$0xff] }
 0x33a   : > { %1252 = vrcp.f32 %v946_v22  ;;  %v957_v28 = vand.u32 2147483647, %v946_v22  ;;  %v959_v10 = vand.u32 2147483648, %v946_v22  ;;  %vm953_vm4 = vweird.f32 %v946_v22 }
 0x33b   : > { %v1251_v58 = vpop.eup %1250 }
 0x33c   : > { %v964_v59 = vmul.f32 %v1251_v58, %v947_v21  ;;  %vm969_vm15 = vweird.f32 %v1251_v58  ;;  %vm958_vm6 = vcmp.eq.f32.partialorder %v957_v28, 8.507059e+37 }
 0x33d   : > { %vm970_vm1 = vmor %vm968_vm0, %vm969_vm15 }
 0x33e   : > { %v965_v62 = vsub.f32 1.0, %v964_v59  ;;  %v1267_v59 = vld [vmem:[%s1587_s8 + $0x50] sm:$0xff] }
 0x340   : > { %v1253_v3 = vpop.eup %1252  ;;  %v966_v7 = vmul.f32 %v1251_v58, %v965_v62 }
 0x341   : > { %v949_v0 = vmul.f32 %v1253_v3, %v946_v22  ;;  %vm954_vm3 = vweird.f32 %v1253_v3  ;;  %v1266_v22 = vld [vmem:[%s1587_s8 + $0x40] sm:$0xff] }
 0x342   : > { %v967_v1 = vadd.f32 %v1251_v58, %v966_v7  ;;  %vm955_vm5 = vmor %vm953_vm4, %vm954_vm3 }
 0x343   : > { %v950_v13 = vsub.f32 1.0, %v949_v0 }
 0x344   : > { %v971_v17 = vsel %vm970_vm1, %v1251_v58, %v967_v1 }
 0x345   : > { %v976_v18 = vsel %vm973_vm2, %v975_v12, %v971_v17  ;;  %v951_v49 = vmul.f32 %v1253_v3, %v950_v13 }
 0x346   : > { %v979_v24 = vperm.slane %v976_v18, 0 }
 0x347   : > { %v952_v25 = vadd.f32 %v1253_v3, %v951_v49 }
 0x348   : > { %v981_v29 = vmul.f32 %v979_v24, %v1720_v45  ;;  %v983_v30 = vmul.f32 %v979_v24, %v1726_v50  ;;  %v985_v14 = vmul.f32 %v979_v24, %v1736_v61  ;;  %v987_v15 = vmul.f32 %v979_v24, %v1746_v16  ;;  %v1257_v16 = vld [vmem:[%s1587_s8 + $0x38] sm:$0xff] }
 0x349   : > { %v989_v31 = vmul.f32 %v979_v24, %v1752_v23  ;;  %v991_v32 = vmul.f32 %v979_v24, %v1764_v34  ;;  %v993_v35 = vmul.f32 %v979_v24, %v1788_v2  ;;  %v995_v61 = vmul.f32 %v979_v24, %v1776_v20  ;;  %v1258_v34 = vld [vmem:[%s1587_s8 + $0x48] sm:$0xff]  ;;  %v1259_v20 = vld [vmem:[%s1587_s8 + $0x58] sm:$0xff] }
 0x34a   : > { %v997_v37 = vadd.f32 %v1254_v36, %v981_v29  ;;  %v999_v45 = vadd.f32 %v1255_v38, %v983_v30  ;;  %v1001_v50 = vadd.f32 %v1256_v39, %v985_v14  ;;  %v1003_v19 = vadd.f32 %v1257_v16, %v987_v15 }
 0x34b   : > { %v960_v23 = vor.u32 1.1754944e-38, %v959_v10  ;;  %v1005_v41 = vadd.f32 %v1258_v34, %v989_v31  ;;  %v956_v2 = vsel %vm955_vm5, %v1253_v3, %v952_v25  ;;  %v1007_v42 = vadd.f32 %v1259_v20, %v991_v32 }
 0x34c   : > { %1013 = vst [vmem:[%s1814_s20 + $0x8] sm:$0xff] %v997_v37  ;;  %v1009_v47 = vadd.f32 %v1260_v46, %v993_v35  ;;  %v1011_v52 = vadd.f32 %v1261_v26, %v995_v61 }
 0x34d   : > { %1015 = vst [vmem:[%s1814_s20 + $0x18] sm:$0xff] %v999_v45  ;;  %v961_v43 = vsel %vm958_vm6, %v960_v23, %v956_v2 }
 0x34e   : > { %1017 = vst [vmem:[%s1814_s20 + $0x28] sm:$0xff] %v1001_v50  ;;  %v978_v48 = vperm.slane %v961_v43, 0 }
 0x34f   : > { %1019 = vst [vmem:[%s1814_s20 + $0x38] sm:$0xff] %v1003_v19 }
 0x350   : > { %1021 = vst [vmem:[%s1814_s20 + $0x48] sm:$0xff] %v1005_v41  ;;  %v980_v53 = vmul.f32 %v978_v48, %v1717_v44  ;;  %v982_v4 = vmul.f32 %v978_v48, %v1723_v51  ;;  %v984_v54 = vmul.f32 %v978_v48, %v1733_v60  ;;  %v986_v55 = vmul.f32 %v978_v48, %v1740_v8  ;;  %v1262_v44 = vld [vmem:[%s1587_s8] sm:$0xff]  ;;  %v1263_v51 = vld [vmem:[%s1587_s8 + $0x10] sm:$0xff] }
 0x351   : > { %1023 = vst [vmem:[%s1814_s20 + $0x58] sm:$0xff] %v1007_v42  ;;  %v988_v56 = vmul.f32 %v978_v48, %v1749_v9  ;;  %v990_v5 = vmul.f32 %v978_v48, %v1761_v33  ;;  %v992_v57 = vmul.f32 %v978_v48, %v1785_v27  ;;  %v994_v9 = vmul.f32 %v978_v48, %v1773_v40  ;;  %v1265_v33 = vld [vmem:[%s1587_s8 + $0x30] sm:$0xff] }
 0x352   : > { %1025 = vst [vmem:[%s1814_s20 + $0x68] sm:$0xff] %v1009_v47  ;;  %v996_v21 = vadd.f32 %v1262_v44, %v980_v53  ;;  %v998_v60 = vadd.f32 %v1263_v51, %v982_v4  ;;  %v1000_v8 = vadd.f32 %v1264_v6, %v984_v54  ;;  %v1002_v27 = vadd.f32 %v1265_v33, %v986_v55  ;;  %v1269_v40 = vld [vmem:[%s1587_s8 + $0x70] sm:$0xff]  ;;  %s1380_s8 = scalar_lea.hbm %s1891_s6, 256 }
 0x353   : > { %1027 = vst [vmem:[%s1814_s20 + $0x78] sm:$0xff] %v1011_v52  ;;  %v1004_v58 = vadd.f32 %v1266_v22, %v988_v56  ;;  %v1006_v62 = vadd.f32 %v1267_v59, %v990_v5  ;;  %v1008_v3 = vadd.f32 %v1268_v63, %v992_v57  ;;  %v1010_v7 = vadd.f32 %v1269_v40, %v994_v9  ;;  %p1382_p2 = scmp.lt.s32.totalorder %s1380_s8, %s1376_s28 }
 0x354   : > { %1012 = vst [vmem:[%s1814_s20] sm:$0xff] %v996_v21 }
 0x355   : > { %1014 = vst [vmem:[%s1814_s20 + $0x10] sm:$0xff] %v998_v60  ;;  %p1383_p9 = por %p1382_p2, %p1381_p11 }
 0x356   : > { %1016 = vst [vmem:[%s1814_s20 + $0x20] sm:$0xff] %v1000_v8 }
 0x357   : > { %1018 = vst [vmem:[%s1814_s20 + $0x30] sm:$0xff] %v1002_v27  ;;  %p1384_p10 = pnand %p1383_p9, %p1379_p8 }
 0x358   : > { %1020 = vst [vmem:[%s1814_s20 + $0x40] sm:$0xff] %v1004_v58 }
 0x359   : > { %1022 = vst [vmem:[%s1814_s20 + $0x50] sm:$0xff] %v1006_v62 }
 0x35a   : > { %1024 = vst [vmem:[%s1814_s20 + $0x60] sm:$0xff] %v1008_v3 }
 0x35b   : > { %1026 = vst [vmem:[%s1814_s20 + $0x70] sm:$0xff] %v1010_v7 }
 0x35c   : > { %1387 = shalt.err (!%p1384_p10)
}
 0x35d   : > { %s1436_s13 = smov 256   ;;  %s1437_s18 = smov 16  }
 0x35e   : > { %1172 = dma.vmem_to_hbm [thread:$0]  (%p1548_p3), %s1042_s11, 2048, %s1044_s12, %s1029_s30, %s1436_s13, %s1436_s13, %s1437_s18  }
 0x35f PF: > { %s1058_s20 = sand.u32 1, %s1418_s23   ;;  %p1899_p12 = scmp.ge.s32.totalorder %s1430_s26, 2 }
 0x360   : > { %s1059_s15 = scalar_lea.sflag [#allocation5], %s1058_s20 }
 0x361   : > { %p1186_p13 = pnand %p1899_p12, %p1511_p6 }
 0x363   : > { %p1187_p0 = pneg %p1186_p13 }
 0x365   : > { %1413 = dma.done.wait (%p1187_p0), %s1059_s15, 2048  }
 0x366   : > { %1415 = vsyncadd (%p1187_p0), %s1059_s15, 4294965248  ;;  %p21_p5 = scmp.ge.s32.totalorder %s1538_s19, 4   ;;  %s1900_s23 = smov %s1422_s24 }
 0x367   : > { %s1901_s24 = smov %s1426_s25  ;;  %s1902_s25 = smov %s1554_s27 }
 0x368   : > { %s1903_s26 = smov %s1538_s19  ;;  %23 = sbr.rel (!%p21_p5) target bundleno = 8 (0x8), region = 97 }
 0x36d   :  { %1065 = vsyncpa [#allocation4], 1 }
 0x36e   :  { %1067 = vsyncpa [#allocation4 + $0x1], 1 }
 0x36f   :  { %1068 = vsyncpa [#allocation7], 1 }
 0x370   :  { %1069 = vsyncpa [#allocation5], 1 }
 0x371   :  { %1071 = vsyncpa [#allocation5 + $0x1], 1 }

</bundles_post_ra>
